<compile_context>
chip_gen: v7x
topology: tpu7x:2x2x1
jax: 0.10.0
libtpu: 0.0.40
codegen_flags: <defaults>
</compile_context>

<pallas_src>
import functools

import jax
import jax.numpy as jnp
from jax.experimental import pallas as pl
from jax.experimental.pallas import tpu as pltpu


def _dwsep_kernel(x_ref, wd_ref, wp_ref, be_ref, o_ref, *, offsets):
    # x_ref : (1, C, S)   zero-padded image, spatial flattened on lanes (S % 128 == 0)
    # wd_ref: (C, K*K)    depthwise weights, one lane per tap
    # wp_ref: (Co, C)     pointwise 1x1 weights
    # be_ref: (Co, 1)     fused bias  (w_pw @ b_dw + b_pw), f32
    # o_ref : (1, Co, S)  lane-dense output slab
    x = x_ref[0]                      # single load of the (C, S) slab
    wd = wd_ref[...]
    S = x.shape[-1]

    # Depthwise conv: per-tap lane roll of the already-loaded slab (XLU) + VPU MAC
    # in the native dtype.  Tap offsets are static, so rolls are static rotations.
    acc = None
    for t, off in enumerate(offsets):
        shifted = pltpu.roll(x, (S - off) % S, axis=1) if (off % S) else x
        term = shifted * wd[:, t:t + 1]          # (C, S) * (C, 1) lane broadcast
        acc = term if acc is None else acc + term

    # Pointwise 1x1 conv: channel mixing as an MXU matmul over the lane-dense
    # spatial axis, f32 accumulation; fused bias added once.
    pw = jnp.dot(wp_ref[...], acc, preferred_element_type=jnp.float32)
    o_ref[0] = (pw + be_ref[...]).astype(o_ref.dtype)


def depth_wise_sep_conv(x, w_dw, b_dw, w_pw, b_pw, *, padding=1, dilation=1):
    """x: (N,C,H,W); w_dw: (C,K,K); b_dw: (C,); w_pw: (Co,C); b_pw: (Co,).

    Equivalent to Conv2d(C,C,K,padding=padding,groups=C,dilation=dilation)
    followed by Conv2d(C,Co,1).  Stride is 1 (as in the reference module).
    """
    N, C, H, W = x.shape
    K = w_dw.shape[-1]
    Co = w_pw.shape[0]
    H_out = H + 2 * padding - dilation * (K - 1)
    W_out = W + 2 * padding - dilation * (K - 1)
    Hp, Wp = H + 2 * padding, W + 2 * padding

    # --- plain-JAX glue -------------------------------------------------------
    # Zero-pad spatially, flatten (Hp, Wp) onto the lane axis, pad to 128 multiple.
    S_real = Hp * Wp
    S = int(pl.cdiv(S_real, 128)) * 128
    x_pad = jnp.pad(x, ((0, 0), (0, 0), (padding, padding), (padding, padding)))
    x_flat = jnp.pad(x_pad.reshape(N, C, S_real),
                     ((0, 0), (0, 0), (0, S - S_real)))

    # Tap offsets in flat (row-major, width Wp) coordinates: off = kh*d*Wp + kw*d.
    offsets = tuple(kh * dilation * Wp + kw * dilation
                    for kh in range(K) for kw in range(K))
    wd_flat = w_dw.reshape(C, K * K)

    # The 1x1 conv is linear, so the depthwise bias is exactly absorbable:
    #   w_pw @ (dw + b_dw) + b_pw == w_pw @ dw + (w_pw @ b_dw + b_pw)
    b_eff = (jnp.dot(w_pw.astype(jnp.float32), b_dw.astype(jnp.float32))
             + b_pw.astype(jnp.float32)).reshape(Co, 1)

    kernel = functools.partial(_dwsep_kernel, offsets=offsets)

    out_flat = pl.pallas_call(
        kernel,
        out_shape=jax.ShapeDtypeStruct((N, Co, S), x.dtype),
        grid_spec=pltpu.PrefetchScalarGridSpec(
            num_scalar_prefetch=0,
            grid=(N,),
            in_specs=[
                pl.BlockSpec((1, C, S), lambda n: (n, 0, 0)),
                pl.BlockSpec((C, K * K), lambda n: (0, 0)),
                pl.BlockSpec((Co, C), lambda n: (0, 0)),
                pl.BlockSpec((Co, 1), lambda n: (0, 0)),
            ],
            out_specs=pl.BlockSpec((1, Co, S), lambda n: (n, 0, 0)),
        ),
        compiler_params=pltpu.CompilerParams(
            dimension_semantics=("parallel",),
            vmem_limit_bytes=64 * 1024 * 1024,
        ),
    )(x_flat, wd_flat, w_pw, b_eff)

    # Valid output positions are the (H_out, W_out) top-left corner of the padded
    # flat grid; un-flatten and crop outside the kernel (pure layout glue).
    return out_flat[:, :, :S_real].reshape(N, Co, Hp, Wp)[:, :, :H_out, :W_out]


def _reference(x, w_dw, b_dw, w_pw, b_pw, *, padding=1, dilation=1):
    """Pure-JAX reference via lax.conv_general_dilated (matches PyTorch semantics)."""
    C = x.shape[1]
    dw_w = w_dw[:, None, :, :]                      # (C,1,K,K) OIHW, groups=C
    y = jax.lax.conv_general_dilated(
        x, dw_w, window_strides=(1, 1),
        padding=[(padding, padding), (padding, padding)],
        rhs_dilation=(dilation, dilation),
        dimension_numbers=("NCHW", "OIHW", "NCHW"),
        feature_group_count=C)
    y = y + b_dw[None, :, None, None]
    pw_w = w_pw[:, :, None, None]                   # (Co,C,1,1)
    z = jax.lax.conv_general_dilated(
        y, pw_w, window_strides=(1, 1), padding="VALID",
        dimension_numbers=("NCHW", "OIHW", "NCHW"))
    return z + b_pw[None, :, None, None]


if __name__ == "__main__":
    key = jax.random.PRNGKey(0)
    N, C, H, W = 2, 4, 16, 16
    Co = 8
    K, pad, dil = 3, 1, 1

    k1, k2, k3, k4, k5 = jax.random.split(key, 5)
    x = jax.random.normal(k1, (N, C, H, W), jnp.float32)
    # Parameter shapes follow nn.Conv2d in the module (depthwise (C,1,K,K) squeezed,
    # pointwise (Co,C,1,1) squeezed).
    w_dw = jax.random.normal(k2, (C, K, K), jnp.float32) * 0.1
    b_dw = jax.random.normal(k3, (C,), jnp.float32) * 0.1
    w_pw = jax.random.normal(k4, (Co, C), jnp.float32) * 0.1
    b_pw = jax.random.normal(k5, (Co,), jnp.float32) * 0.1

    out = depth_wise_sep_conv(x, w_dw, b_dw, w_pw, b_pw, padding=pad, dilation=dil)
    out = jax.block_until_ready(out)

    ref = _reference(x, w_dw, b_dw, w_pw, b_pw, padding=pad, dilation=dil)
    assert out.shape == (N, Co, H, W), out.shape
    err = float(jnp.max(jnp.abs(out - ref)))
    assert jnp.allclose(out, ref, atol=1e-4, rtol=1e-4), err
    print("KERNEL_OK")
</pallas_src>

<mosaic_0001>
module attributes {stable_mosaic.version = 11 : i64} {
  func.func @_dwsep_kernel(%arg0: i32, %arg1: memref<1x4x384xf32, #tpu.memory_space<vmem>>, %arg2: memref<4x9xf32, #tpu.memory_space<vmem>>, %arg3: memref<8x4xf32, #tpu.memory_space<vmem>>, %arg4: memref<8x1xf32, #tpu.memory_space<vmem>>, %arg5: memref<1x8x384xf32, #tpu.memory_space<vmem>>) attributes {dimension_semantics = [#tpu.dimension_semantics<parallel>], iteration_bounds = array<i64: 2>, scalar_prefetch = 0 : i64, scratch_operands = 0 : i64, tpu.core_type = #tpu.core_type<tc>, window_params = [{transform_indices = @transform_0, window_bounds = array<i64: 1, 4, 384>}, {pipeline_mode = #tpu.pipeline_mode<synchronous>, transform_indices = @transform_1, window_bounds = array<i64: 4, 9>}, {pipeline_mode = #tpu.pipeline_mode<synchronous>, transform_indices = @transform_2, window_bounds = array<i64: 8, 4>}, {pipeline_mode = #tpu.pipeline_mode<synchronous>, transform_indices = @transform_3, window_bounds = array<i64: 8, 1>}, {transform_indices = @transform_4, window_bounds = array<i64: 1, 8, 384>}]} {
    %c0 = arith.constant 0 : index
    %c0_0 = arith.constant 0 : index
    %c0_1 = arith.constant 0 : index
    %0 = vector.load %arg1[%c0, %c0_0, %c0_1] : memref<1x4x384xf32, #tpu.memory_space<vmem>>, vector<1x4x384xf32>
    %1 = vector.shape_cast %0 : vector<1x4x384xf32> to vector<4x384xf32>
    %c0_2 = arith.constant 0 : index
    %c0_3 = arith.constant 0 : index
    %2 = vector.load %arg2[%c0_2, %c0_3] : memref<4x9xf32, #tpu.memory_space<vmem>>, vector<4x9xf32>
    %3 = vector.extract_strided_slice %2 {offsets = [0, 0], sizes = [4, 1], strides = [1, 1]} : vector<4x9xf32> to vector<4x1xf32>
    %4 = vector.broadcast %3 : vector<4x1xf32> to vector<4x384xf32>
    %5 = arith.mulf %1, %4 : vector<4x384xf32>
    %c383_i32 = arith.constant 383 : i32
    %6 = tpu.dynamic_rotate %1 by %c383_i32 dim 1 : vector<4x384xf32>, i32 -> vector<4x384xf32>
    %7 = vector.extract_strided_slice %2 {offsets = [0, 1], sizes = [4, 1], strides = [1, 1]} : vector<4x9xf32> to vector<4x1xf32>
    %8 = vector.broadcast %7 : vector<4x1xf32> to vector<4x384xf32>
    %9 = arith.mulf %6, %8 : vector<4x384xf32>
    %10 = arith.addf %5, %9 : vector<4x384xf32>
    %c382_i32 = arith.constant 382 : i32
    %11 = tpu.dynamic_rotate %1 by %c382_i32 dim 1 : vector<4x384xf32>, i32 -> vector<4x384xf32>
    %12 = vector.extract_strided_slice %2 {offsets = [0, 2], sizes = [4, 1], strides = [1, 1]} : vector<4x9xf32> to vector<4x1xf32>
    %13 = vector.broadcast %12 : vector<4x1xf32> to vector<4x384xf32>
    %14 = arith.mulf %11, %13 : vector<4x384xf32>
    %15 = arith.addf %10, %14 : vector<4x384xf32>
    %c366_i32 = arith.constant 366 : i32
    %16 = tpu.dynamic_rotate %1 by %c366_i32 dim 1 : vector<4x384xf32>, i32 -> vector<4x384xf32>
    %17 = vector.extract_strided_slice %2 {offsets = [0, 3], sizes = [4, 1], strides = [1, 1]} : vector<4x9xf32> to vector<4x1xf32>
    %18 = vector.broadcast %17 : vector<4x1xf32> to vector<4x384xf32>
    %19 = arith.mulf %16, %18 : vector<4x384xf32>
    %20 = arith.addf %15, %19 : vector<4x384xf32>
    %c365_i32 = arith.constant 365 : i32
    %21 = tpu.dynamic_rotate %1 by %c365_i32 dim 1 : vector<4x384xf32>, i32 -> vector<4x384xf32>
    %22 = vector.extract_strided_slice %2 {offsets = [0, 4], sizes = [4, 1], strides = [1, 1]} : vector<4x9xf32> to vector<4x1xf32>
    %23 = vector.broadcast %22 : vector<4x1xf32> to vector<4x384xf32>
    %24 = arith.mulf %21, %23 : vector<4x384xf32>
    %25 = arith.addf %20, %24 : vector<4x384xf32>
    %c364_i32 = arith.constant 364 : i32
    %26 = tpu.dynamic_rotate %1 by %c364_i32 dim 1 : vector<4x384xf32>, i32 -> vector<4x384xf32>
    %27 = vector.extract_strided_slice %2 {offsets = [0, 5], sizes = [4, 1], strides = [1, 1]} : vector<4x9xf32> to vector<4x1xf32>
    %28 = vector.broadcast %27 : vector<4x1xf32> to vector<4x384xf32>
    %29 = arith.mulf %26, %28 : vector<4x384xf32>
    %30 = arith.addf %25, %29 : vector<4x384xf32>
    %c348_i32 = arith.constant 348 : i32
    %31 = tpu.dynamic_rotate %1 by %c348_i32 dim 1 : vector<4x384xf32>, i32 -> vector<4x384xf32>
    %32 = vector.extract_strided_slice %2 {offsets = [0, 6], sizes = [4, 1], strides = [1, 1]} : vector<4x9xf32> to vector<4x1xf32>
    %33 = vector.broadcast %32 : vector<4x1xf32> to vector<4x384xf32>
    %34 = arith.mulf %31, %33 : vector<4x384xf32>
    %35 = arith.addf %30, %34 : vector<4x384xf32>
    %c347_i32 = arith.constant 347 : i32
    %36 = tpu.dynamic_rotate %1 by %c347_i32 dim 1 : vector<4x384xf32>, i32 -> vector<4x384xf32>
    %37 = vector.extract_strided_slice %2 {offsets = [0, 7], sizes = [4, 1], strides = [1, 1]} : vector<4x9xf32> to vector<4x1xf32>
    %38 = vector.broadcast %37 : vector<4x1xf32> to vector<4x384xf32>
    %39 = arith.mulf %36, %38 : vector<4x384xf32>
    %40 = arith.addf %35, %39 : vector<4x384xf32>
    %c346_i32 = arith.constant 346 : i32
    %41 = tpu.dynamic_rotate %1 by %c346_i32 dim 1 : vector<4x384xf32>, i32 -> vector<4x384xf32>
    %42 = vector.extract_strided_slice %2 {offsets = [0, 8], sizes = [4, 1], strides = [1, 1]} : vector<4x9xf32> to vector<4x1xf32>
    %43 = vector.broadcast %42 : vector<4x1xf32> to vector<4x384xf32>
    %44 = arith.mulf %41, %43 : vector<4x384xf32>
    %45 = arith.addf %40, %44 : vector<4x384xf32>
    %c0_4 = arith.constant 0 : index
    %c0_5 = arith.constant 0 : index
    %46 = vector.load %arg3[%c0_4, %c0_5] : memref<8x4xf32, #tpu.memory_space<vmem>>, vector<8x4xf32>
    %cst = arith.constant dense<0.000000e+00> : vector<8x384xf32>
    %47 = tpu.matmul %46, %45, %cst {dimension_numbers = #tpu.dot_dimension_numbers<[1], [0], [0], [1], [0, 0, 1, 1], [], []>} : vector<8x4xf32>, vector<4x384xf32>, vector<8x384xf32> -> vector<8x384xf32>
    %c0_6 = arith.constant 0 : index
    %c0_7 = arith.constant 0 : index
    %48 = vector.load %arg4[%c0_6, %c0_7] : memref<8x1xf32, #tpu.memory_space<vmem>>, vector<8x1xf32>
    %49 = vector.broadcast %48 : vector<8x1xf32> to vector<8x384xf32>
    %50 = arith.addf %47, %49 : vector<8x384xf32>
    %c0_8 = arith.constant 0 : index
    %c0_9 = arith.constant 0 : index
    %c0_10 = arith.constant 0 : index
    %51 = vector.load %arg5[%c0_8, %c0_9, %c0_10] : memref<1x8x384xf32, #tpu.memory_space<vmem>>, vector<1x8x384xf32>
    %52 = vector.shape_cast %51 : vector<1x8x384xf32> to vector<8x384xf32>
    %53 = vector.shape_cast %50 : vector<8x384xf32> to vector<1x8x384xf32>
    tpu.vector_store %arg5[%c0_8, %c0_9, %c0_10], %53 {strides = array<i32>} : memref<1x8x384xf32, #tpu.memory_space<vmem>>, vector<1x8x384xf32>,
    return
  }
  func.func @transform_0(%arg0: i32) -> (i32, i32, i32) {
    %c0_i32 = arith.constant 0 : i32
    %c0_i32_0 = arith.constant 0 : i32
    %c0_i32_1 = arith.constant 0 : i32
    return %arg0, %c0_i32, %c0_i32_0 : i32, i32, i32
  }
  func.func @transform_1(%arg0: i32) -> (i32, i32) {
    %c0_i32 = arith.constant 0 : i32
    %c0_i32_0 = arith.constant 0 : i32
    %c0_i32_1 = arith.constant 0 : i32
    return %c0_i32, %c0_i32_0 : i32, i32
  }
  func.func @transform_2(%arg0: i32) -> (i32, i32) {
    %c0_i32 = arith.constant 0 : i32
    %c0_i32_0 = arith.constant 0 : i32
    %c0_i32_1 = arith.constant 0 : i32
    return %c0_i32, %c0_i32_0 : i32, i32
  }
  func.func @transform_3(%arg0: i32) -> (i32, i32) {
    %c0_i32 = arith.constant 0 : i32
    %c0_i32_0 = arith.constant 0 : i32
    %c0_i32_1 = arith.constant 0 : i32
    return %c0_i32, %c0_i32_0 : i32, i32
  }
  func.func @transform_4(%arg0: i32) -> (i32, i32, i32) {
    %c0_i32 = arith.constant 0 : i32
    %c0_i32_0 = arith.constant 0 : i32
    %c0_i32_1 = arith.constant 0 : i32
    return %arg0, %c0_i32, %c0_i32_0 : i32, i32, i32
  }
}

</mosaic_0001>

<bundles_post_ra>
// kernel: tpu_custom_call.1
= control target key start
LH: loop header
LB: loop body
LE: loop exit
PB: predicated region body
PF: predicated region fallthrough
CT: control target
= control target key end

     0   :  { %9 = vsyncpa [#allocation3], 0  ;;  %s1464_s0 = inlined_call_operand.hbm [shape: f32[2,4,384], index: 0, kind: input, shape index: {}]   ;;  %s1465_s1 = inlined_call_operand.hbm [shape: f32[4,9], index: 1, kind: input, shape index: {}]   ;;  %s1466_s2 = inlined_call_operand.hbm [shape: f32[8,4], index: 2, kind: input, shape index: {}]   ;;  %s1467_s3 = inlined_call_operand.hbm [shape: f32[8,1], index: 3, kind: input, shape index: {}]   ;;  %s1468_s4 = inlined_call_operand.hbm [shape: f32[2,8,384], index: 4, kind: output, shape index: {}]  }
   0x1   :  { %11 = vsyncpa [#allocation3 + $0x1], 0 }
   0x2   :  { %12 = vsyncpa [#allocation6], 0 }
   0x3   :  { %13 = vsyncpa [#allocation9], 0 }
   0x4   :  { %14 = vsyncpa [#allocation4], 0 }
   0x5   :  { %16 = vsyncpa [#allocation4 + $0x1], 0  ;;  %s1117_s15 = smov 0   ;;  %s1119_s16 = smov 0  }
   0x6   :  { %s1121_s17 = smov 0   ;;  %s1123_s18 = smov 0  }
   0x7 LB: > { %s1138_s19 = sadd.s32 4294967295, %s1065_s18   ;;  %s737_s20 = sadd.s32 4294967294, %s1065_s18   ;;  %s1065_s18 = sphi %s1123_s18, %s1491_s18   ;;  %s1061_s17 = sphi %s1121_s17, %s1490_s17   ;;  %s1057_s16 = sphi %s1119_s16, %s1489_s16   ;;  %s1053_s15 = sphi %s1117_s15, %s1488_s15  }
   0x8   : > { %p42_p0 = scmp.ne.s32.totalorder %s1057_s16, %s1053_s15  ;;  %p1469_p1 = scmp.eq.s32.totalorder %s1138_s19, 0 }
   0x9   : > { %p135_p3 = scmp.eq.s32.totalorder %s737_s20, 1  ;;  %p738_p5 = scmp.ge.s32.totalorder %s1065_s18, 1 }
   0xa   : > { %p1147_p4 = por %p1469_p1, %p42_p0  ;;  %p142_p7 = scmp.lt.s32.totalorder %s1065_s18, 3 }
   0xb   : > { %p1152_p6 = por %p135_p3, %p42_p0  ;;  %s1067_s24 = smov [#allocation5]  }
   0xc   : > { %s1472_s21 = scalar_select %p1147_p4, 1, 0 }
   0xd   : > { %s1473_s22 = scalar_select %p1152_p6, 1, 0 }
   0xe   : > { %p1157_p8 = pnand %p738_p5, %p142_p7  ;;  %s155_s25 = sshll.u32 %s1067_s24, 4  ;;  %s156_s25 = int_to_ptr.vmem [resolvable:$true] %s155_s25 }
   0xf   : > { %s1068_s26 = smov [#allocation7]   ;;  %s1069_s29 = smov [#allocation8]  }
  0x10   : > { %s1474_s23 = scalar_select %p1157_p8, 1, 0 }
  0x11   : > { %p784_p10 = pneg %p1157_p8  ;;  %s166_s27 = sshll.u32 %s1068_s26, 4  ;;  %s1170_s27 = int_to_ptr.vmem [resolvable:$true] %s166_s27 }
  0x12   : > { %s177_s30 = sshll.u32 %s1069_s29, 4  ;;  %s877_s7 = scalar_lea.hbm %s1465_s1, 64  ;;  %s1172_s30 = int_to_ptr.vmem [resolvable:$true] %s177_s30 }
  0x13   : > { %p1166_p11 = pnand %p784_p10, %p1469_p1  ;;  %p878_p12 = scmp.ne.s32.totalorder %s1465_s1, %s877_s7 }
  0x14   : > { %p884_p5 = scmp.lt.u32.totalorder %s877_s7, %s1465_s1 }
  0x15   : > { %p1182_p13 = pneg %p1166_p11 }
  0x17   : > { %p880_p0 = pnand %p1182_p13, %p878_p12 }
  0x19   : > { %p881_p3 = pneg %p880_p0 }
  0x1b   : > { %p886_p7 = pnand %p884_p5, %p881_p3 }
  0x1d   : > { %889 = shalt.err (!%p886_p7)
}
  0x1e   : > { %s890_s13 = scalar_lea.vmem %s156_s25, 64  ;;  %p898_p2 = scmp.lt.s32.totalorder %s156_s25, %s156_s25 }
  0x1f   : > { %p891_p10 = scmp.ne.s32.totalorder %s156_s25, %s890_s13  ;;  %p899_p6 = scmp.lt.s32.totalorder %s890_s13, %s890_s13 }
  0x21   : > { %p893_p9 = pnand %p891_p10, %p1182_p13  ;;  %p900_p4 = por %p899_p6, %p898_p2 }
  0x23   : > { %p894_p1 = pneg %p893_p9 }
  0x25   : > { %p901_p8 = pnand %p900_p4, %p894_p1 }
  0x27   : > { %904 = shalt.err (!%p901_p8)
}
  0x28   : > { %787 = dma.hbm_to_vmem [thread:$0]  (!%p1166_p11), %s1465_s1, 64, %s156_s25, [#allocation6]  }
  0x29   : > { %s905_s29 = scalar_lea.hbm %s1466_s2, 128 }
  0x2a   : > { %p906_p9 = scmp.ne.s32.totalorder %s1466_s2, %s905_s29  ;;  %p912_p1 = scmp.lt.u32.totalorder %s905_s29, %s1466_s2 }
  0x2c   : > { %p908_p12 = pnand %p906_p9, %p1182_p13 }
  0x2e   : > { %p909_p2 = pneg %p908_p12 }
  0x30   : > { %p914_p4 = pnand %p912_p1, %p909_p2 }
  0x32   : > { %917 = shalt.err (!%p914_p4)
}
  0x33   : > { %s918_s25 = scalar_lea.vmem %s1170_s27, 128  ;;  %p926_p3 = scmp.lt.s32.totalorder %s1170_s27, %s1170_s27 }
  0x34   : > { %p919_p6 = scmp.ne.s32.totalorder %s1170_s27, %s918_s25  ;;  %p927_p5 = scmp.lt.s32.totalorder %s918_s25, %s918_s25 }
  0x36   : > { %p921_p8 = pnand %p919_p6, %p1182_p13  ;;  %p928_p7 = por %p927_p5, %p926_p3 }
  0x38   : > { %p922_p0 = pneg %p921_p8 }
  0x3a   : > { %p929_p10 = pnand %p928_p7, %p922_p0 }
  0x3c   : > { %932 = shalt.err (!%p929_p10)
}
  0x3d   : > { %790 = dma.hbm_to_vmem [thread:$0]  (!%p1166_p11), %s1466_s2, 128, %s1170_s27, [#allocation6]  }
  0x3e   : > { %s933_s14 = scalar_lea.hbm %s1467_s3, 128 }
  0x3f   : > { %p934_p9 = scmp.ne.s32.totalorder %s1467_s3, %s933_s14  ;;  %p940_p1 = scmp.lt.u32.totalorder %s933_s14, %s1467_s3 }
  0x41   : > { %p936_p12 = pnand %p934_p9, %p1182_p13 }
  0x43   : > { %p937_p2 = pneg %p936_p12 }
  0x45   : > { %p942_p4 = pnand %p940_p1, %p937_p2 }
  0x47   : > { %945 = shalt.err (!%p942_p4)
}
  0x48   : > { %s946_s27 = scalar_lea.vmem %s1172_s30, 128  ;;  %p954_p3 = scmp.lt.s32.totalorder %s1172_s30, %s1172_s30 }
  0x49   : > { %p947_p6 = scmp.ne.s32.totalorder %s1172_s30, %s946_s27  ;;  %p955_p5 = scmp.lt.s32.totalorder %s946_s27, %s946_s27 }
  0x4b   : > { %p949_p8 = pnand %p947_p6, %p1182_p13  ;;  %p956_p7 = por %p955_p5, %p954_p3 }
  0x4d   : > { %p950_p0 = pneg %p949_p8 }
  0x4f   : > { %p957_p10 = pnand %p956_p7, %p950_p0 }
  0x51   : > { %960 = shalt.err (!%p957_p10)
}
  0x52   : > { %793 = dma.hbm_to_vmem [thread:$0]  (!%p1166_p11), %s1467_s3, 128, %s1172_s30, [#allocation9]  }
  0x53   : > { %s1245_s10 = sadd.s32 1, %s1065_s18   ;;  %s29_s7 = sadd.s32 1, %s1061_s17 }
  0x54   : > { %s26_s28 = ssub.s32 %s1065_s18, %s1245_s10  ;;  %p36_p9 = scmp.ne.s32.totalorder %s1061_s17, %s1057_s16 }
  0x55   : > { %p27_p13 = scmp.eq.s32.totalorder %s26_s28, 0  ;;  %p37_p12 = scmp.eq.s32.totalorder %s1065_s18, 0 }
  0x56   : > { %p805_p2 = scmp.lt.s32.totalorder %s1065_s18, 2  ;;  %p1477_p4 = scmp.eq.s32.totalorder %s1138_s19, 1 }
  0x57   : > { %s1255_s8 = scalar_select %p27_p13, %s1061_s17, %s29_s7  }
  0x58   : > { %p38_p1 = por %p37_p12, %p36_p9  ;;  %p1259_p6 = por %p1477_p4, %p36_p9 }
  0x59   : > { %s188_s9 = sand.u32 1, %s1061_s17   ;;  %s764_s11 = smul.u32 192, %s1065_s18 }
  0x5a   : > { %s763_s30 = smul.u32 12, %s188_s9  ;;  %p1265_p11 = pnand %p805_p2, %p38_p1 }
  0x5b   : > { %s1272_s20 = scalar_lea.hbm %s1464_s0, %s764_s11  ;;  %s189_s29 = scalar_lea.sflag [#allocation3], %s188_s9 }
  0x5c   : > { %s192_s24 = scalar_lea.vmem [#allocation2], %s763_s30  ;;  %s961_s27 = scalar_lea.hbm %s1272_s20, 192 }
  0x5d   : > { %s200_s26 = sshll.u32 %s192_s24, 4  ;;  %p962_p8 = scmp.ne.s32.totalorder %s1272_s20, %s961_s27  ;;  %s1274_s26 = int_to_ptr.vmem [resolvable:$true] %s200_s26 }
  0x5e   : > { %p963_p0 = pneg %p1265_p11  ;;  %s966_s28 = scalar_lea.hbm %s1464_s0, 384 }
  0x5f   : > { %p967_p7 = scmp.lt.u32.totalorder %s1272_s20, %s1464_s0  ;;  %p968_p10 = scmp.lt.u32.totalorder %s966_s28, %s961_s27 }
  0x60   : > { %p964_p3 = pnand %p963_p0, %p962_p8  ;;  %p970_p9 = scmp.lt.u32.totalorder %s961_s27, %s1272_s20 }
  0x61   : > { %p969_p13 = por %p968_p10, %p967_p7 }
  0x62   : > { %p965_p5 = pneg %p964_p3 }
  0x63   : > { %p971_p12 = por %p970_p9, %p969_p13 }
  0x65   : > { %p972_p2 = pnand %p971_p12, %p965_p5 }
  0x67   : > { %975 = shalt.err (!%p972_p2)
}
  0x68   : > { %s976_s9 = scalar_lea.vmem %s1274_s26, 192  ;;  %s1070_s30 = smov [#allocation2]  }
  0x69   : > { %p977_p1 = scmp.ne.s32.totalorder %s1274_s26, %s976_s9  ;;  %s981_s13 = sshll.u32 %s1070_s30, 4  ;;  %s982_s13 = int_to_ptr.vmem [resolvable:$false] %s981_s13 }
  0x6a   : > { %s983_s14 = scalar_lea.vmem %s982_s13, 384  ;;  %p984_p3 = scmp.lt.s32.totalorder %s1274_s26, %s982_s13 }
  0x6b   : > { %p979_p4 = pnand %p977_p1, %p963_p0  ;;  %p985_p7 = scmp.lt.s32.totalorder %s983_s14, %s976_s9 }
  0x6d   : > { %p980_p8 = pneg %p979_p4  ;;  %p986_p10 = por %p985_p7, %p984_p3 }
  0x6f   : > { %p987_p13 = pnand %p986_p10, %p980_p8 }
  0x71   : > { %990 = shalt.err (!%p987_p13)
}
  0x72   : > { %797 = dma.hbm_to_vmem [thread:$0]  (!%p1265_p11), %s1272_s20, 192, %s1274_s26, %s189_s29  }
  0x73   : > { %p1480_p5 = scmp.ne.s32.totalorder %s1474_s23, 0 }
  0x74   : > { %s1304_s24 = sand.u32 (!%p1480_p5), 1, %s1057_s16   ;;  %p1481_p0 = scmp.ne.s32.totalorder (!%p1480_p5), %s1472_s21, 0 }
  0x75   : > { %209 = sbr.rel (%p1480_p5) target bundleno = 566 (0x236), region = 36  ;;  %s212_s5 = scalar_lea.sflag (!%p1480_p5), [#allocation3], %s1304_s24 }
  0x76   : > { %s765_s27 = smul.u32 (!%p1480_p5), 12, %s1304_s24 }
  0x78   : > { %s215_s6 = scalar_lea.vmem (!%p1480_p5), [#allocation2], %s765_s27 }
  0x7c   : > { %1036 = dma.done.wait (%p1481_p0), %s212_s5, 192  }
  0x7d   : > { %1038 = vsyncadd (%p1481_p0), %s212_s5, 4294967104  ;;  %p1482_p9 = scmp.eq.s32.totalorder %s1138_s19, 0 }
  0x7f   : > { %1040 = dma.done.wait (%p1482_p9), [#allocation6], 192   ;;  %p1483_p11 = pmov %p1482_p9 }
  0x80   : > { %p1484_p12 = pmov %p1482_p9 }
  0x81   : > { %1042 = vsyncadd (%p1483_p11), [#allocation6], 4294967104 }
  0x82   : > { %1044 = dma.done.wait (%p1484_p12), [#allocation9], 128   ;;  %p1485_p2 = pmov %p1482_p9 }
  0x83   : > { %v1071_v0 = vmov 2   ;;  %v1072_v1 = vmov 0   ;;  %v254_v2 = vld [vmem:[#allocation5] sm:$0xf]  ;;  %v1320_v3 = vld [vmem:[%s215_s6] sm:$0xff]  ;;  %v1073_v4 = vmov 3   ;;  %v262_v35 = vlaneseq }
  0x84   : > { %1046 = vsyncadd (%p1485_p2), [#allocation9], 4294967168  ;;  %867 = vset.pattern.permute.xlu1 %v1071_v0  ;;  %865 = vset.pattern.permute.xlu0 %v1072_v1  ;;  %v1074_v5 = vmov 1   ;;  %v270_v6 = vcombine.high %v1320_v3, %v1320_v3  ;;  %s1075_s21 = smov 127   ;;  %v1076_v7 = vmov 4   ;;  %v1077_v9 = vmov 5  }
  0x85   : > { %308 = vperm.xlu1 %867, %v254_v2   ;;  %257 = vperm.xlu0 %865, %v254_v2   ;;  %v1325_v8 = vld [vmem:[%s215_s6 + $0x8] sm:$0xf]  ;;  %s1078_s23 = smov 126   ;;  %s1079_s12 = smov 110   ;;  %v1081_v10 = vmov 6   ;;  %v1083_v11 = vmov 7  }
  0x86   : > { %s1080_s20 = smov 109   ;;  %s1082_s26 = smov 108   ;;  %v1085_v12 = vmov 8   ;;  %v1088_v13 = vmov 0.0   ;;  %vm1089_vm0 = vmmov 0   ;;  %v459_v14 = vld [vmem:[#allocation8] sm:$0xff] }
  0x87   : > { %s1084_s29 = smov 92   ;;  %s1086_s28 = smov 91   ;;  %758 = vmatprep.subr.mxu1 %v1088_v13  ;;  %543 = vmatprep.mubr.f32.mxu0 %v1088_v13  ;;  %v1090_v33 = vmov 839922192   ;;  %v263_v39 = vshrl.u32 %v262_v35, 7  ;;  %v1348_v40 = vand.u32 127, %v262_v35 }
  0x88   : > { %s1087_s7 = smov 90   ;;  %760 = vmatprep.mubr.msk.f32.mxu1 %vm1089_vm0, %v1088_v13  ;;  %v260_v34 = vunpack.c.l.s4 %v1090_v33  ;;  %vm472_vm9 = vcmask 1043456   ;;  %vm468_vm10 = vcmask 31744   ;;  %s766_s11 = smul.u32 24, %s1304_s24 }
  0x89   : > { %868 = vset.pattern.permute.xlu1 %v1073_v4  ;;  %866 = vset.pattern.permute.xlu0 %v1074_v5  ;;  %vm280_vm1 = vcmp.lt.s32.totalorder %v1348_v40, 127  ;;  %vm303_vm2 = vcmp.lt.s32.totalorder %v1348_v40, 126  ;;  %vm326_vm3 = vcmp.lt.s32.totalorder %v1348_v40, 110  ;;  %vm349_vm4 = vcmp.lt.s32.totalorder %v1348_v40, 109  ;;  %s767_s30 = smul.u32 384, %s1138_s19  ;;  %s624_s6 = scalar_lea.sflag [#allocation4], %s1304_s24 }
  0x8a   : > { %331 = vperm.xlu1 %868, %v254_v2   ;;  %285 = vperm.xlu0 %866, %v254_v2   ;;  %v261_v38 = vunpack.c.0.s8 %v260_v34  ;;  %vm372_vm5 = vcmp.lt.s32.totalorder %v1348_v40, 108  ;;  %vm395_vm6 = vcmp.lt.s32.totalorder %v1348_v40, 92  ;;  %vm418_vm7 = vcmp.lt.s32.totalorder %v1348_v40, 91  ;;  %s251_s9 = scalar_lea.vmem [#allocation10], %s766_s11  ;;  %s1091_s19 = smov [#allocation10]  }
  0x8b   : > { %vm441_vm8 = vcmp.lt.s32.totalorder %v1348_v40, 90  ;;  %s638_s13 = sshll.u32 %s251_s9, 4  ;;  %s1420_s5 = scalar_lea.hbm %s1468_s4, %s767_s30  ;;  %s1422_s13 = int_to_ptr.vmem [resolvable:$true] %s638_s13 }
  0x8c   : > { %v264_v43 = vsub.s32 %v261_v38, %v263_v39 }
  0x8e   : > { %272 = vrot.lane.b32.xlu1 %v1320_v3, %s1075_s21  ;;  %274 = vrot.lane.b32.xlu0 %v270_v6, %s1075_s21 }
  0x8f   : > { %869 = vset.pattern.permute.xlu0 %v1076_v7  ;;  %870 = vset.pattern.permute.xlu1 %v1077_v9 }
  0x92   : > { %276 = vrot.lane.b32.xlu1 %v1325_v8, %s1075_s21  ;;  %354 = vperm.xlu0 %869, %v254_v2   ;;  %s991_s21 = scalar_lea.vmem %s1422_s13, 384 }
  0x93   : > { %p992_p1 = scmp.ne.s32.totalorder %s1422_s13, %s991_s21 }
  0x95   : > { %p993_p4 = pnand %p992_p1, %p1259_p6 }
  0x96   : > { %297 = vrot.lane.b32.xlu1 %v1320_v3, %s1078_s23  ;;  %301 = vrot.lane.b32.xlu0 %v1325_v8, %s1078_s23 }
  0x97   : > { %875 = vset.pattern.permute.xlu0 %v1072_v1  ;;  %p994_p8 = pneg %p993_p4 }
  0x9a   : > { %299 = vrot.lane.b32.xlu1 %v270_v6, %s1078_s23  ;;  %320 = vrot.lane.b32.xlu0 %v1320_v3, %s1079_s12  ;;  %s995_s23 = sshll.u32 %s1091_s19, 4  ;;  %s996_s23 = int_to_ptr.vmem [resolvable:$false] %s995_s23 }
  0x9b   : > { %p998_p3 = scmp.lt.s32.totalorder %s1422_s13, %s996_s23 }
  0x9e   : > { %377 = vperm.xlu1 %870, %v254_v2   ;;  %324 = vrot.lane.b32.xlu0 %v1325_v8, %s1079_s12 }
  0xa2   : > { %322 = vrot.lane.b32.xlu1 %v270_v6, %s1079_s12  ;;  %343 = vrot.lane.b32.xlu0 %v1320_v3, %s1080_s20  ;;  %s997_s12 = scalar_lea.vmem %s996_s23, 768 }
  0xa3   : > { %871 = vset.pattern.permute.xlu1 %v1081_v10  ;;  %p999_p7 = scmp.lt.s32.totalorder %s997_s12, %s991_s21 }
  0xa5   : > { %p1000_p10 = por %p999_p7, %p998_p3 }
  0xa6   : > { %400 = vperm.xlu1 %871, %v254_v2   ;;  %347 = vrot.lane.b32.xlu0 %v1325_v8, %s1080_s20 }
  0xa7   : > { %p1001_p13 = pnand %p1000_p10, %p994_p8 }
  0xaa   : > { %345 = vrot.lane.b32.xlu1 %v270_v6, %s1080_s20  ;;  %366 = vrot.lane.b32.xlu0 %v1320_v3, %s1082_s26 }
  0xab   : > { %872 = vset.pattern.permute.xlu1 %v1083_v11 }
  0xae   : > { %423 = vperm.xlu1 %872, %v254_v2   ;;  %370 = vrot.lane.b32.xlu0 %v1325_v8, %s1082_s26 }
  0xb2   : > { %368 = vrot.lane.b32.xlu1 %v270_v6, %s1082_s26  ;;  %389 = vrot.lane.b32.xlu0 %v1320_v3, %s1084_s29 }
  0xb3   : > { %873 = vset.pattern.permute.xlu1 %v1085_v12 }
  0xb6   : > { %446 = vperm.xlu1 %873, %v254_v2   ;;  %393 = vrot.lane.b32.xlu0 %v1325_v8, %s1084_s29 }
  0xba   : > { %391 = vrot.lane.b32.xlu1 %v270_v6, %s1084_s29  ;;  %414 = vrot.lane.b32.xlu0 %v270_v6, %s1086_s28 }
  0xbb   : > { %874 = vset.pattern.permute.xlu1 %v1072_v1 }
  0xbe   : > { %412 = vrot.lane.b32.xlu1 %v1320_v3, %s1086_s28  ;;  %435 = vrot.lane.b32.xlu0 %v1320_v3, %s1087_s7 }
  0xc2   : > { %416 = vrot.lane.b32.xlu1 %v1325_v8, %s1086_s28  ;;  %439 = vrot.lane.b32.xlu0 %v1325_v8, %s1087_s7 }
  0xc6   : > { %437 = vrot.lane.b32.xlu1 %v270_v6, %s1087_s7 }
  0xca   : > { %462 = vperm.xlu1 %874, %v459_v14  }
 0x104   : > { %v309_v15 = vpop.permute.xlu1 %308  ;;  %v258_v16 = vpop.permute.xlu0 %257 }
 0x105   : > { %v265_v48 = vrot.slane %v258_v16, %v264_v43 }
 0x107   : > { %v268_v63 = vmul.f32 %v265_v48, %v1325_v8  ;;  %v267_v9 = vmul.f32 %v265_v48, %v1320_v3 }
 0x109   : > { %v332_v17 = vpop.permute.xlu1 %331  ;;  %v286_v18 = vpop.permute.xlu0 %285 }
 0x10d   : > { %v273_v19 = vpop.permute.xlu1 %272  ;;  %v275_v20 = vpop.permute.xlu0 %274 }
 0x10e   : > { %v282_v49 = vsel %vm280_vm1, %v273_v19, %v275_v20 }
 0x10f   : > { %v288_v57 = vmul.f32 %v286_v18, %v282_v49 }
 0x111   : > { %v277_v21 = vpop.permute.xlu1 %276  ;;  %v1342_v22 = vpop.permute.xlu0 %354 }
 0x112   : > { %v281_v44 = vsel %vm280_vm1, %v275_v20, %v277_v21  ;;  %v283_v45 = vsel %vm280_vm1, %v277_v21, %v273_v19 }
 0x113   : > { %v289_v52 = vmul.f32 %v286_v18, %v281_v44  ;;  %v290_v54 = vmul.f32 %v286_v18, %v283_v45 }
 0x115   : > { %v298_v23 = vpop.permute.xlu1 %297  ;;  %v302_v24 = vpop.permute.xlu0 %301  ;;  %v293_v4 = vcombine.low %v288_v57, %v289_v52  ;;  %v296_v10 = vadd.f32 %v290_v54, %v268_v63 }
 0x116   : > { %v306_v53 = vsel %vm303_vm2, %v302_v24, %v298_v23 }
 0x117   : > { %v313_v0 = vmul.f32 %v309_v15, %v306_v53  ;;  %v295_v20 = vadd.f32 %v293_v4, %v267_v9 }
 0x119   : > { %v300_v25 = vpop.permute.xlu1 %299  ;;  %v321_v26 = vpop.permute.xlu0 %320  ;;  %v319_v18 = vadd.f32 %v313_v0, %v296_v10 }
 0x11a   : > { %v304_v50 = vsel %vm303_vm2, %v300_v25, %v302_v24  ;;  %v305_v51 = vsel %vm303_vm2, %v298_v23, %v300_v25 }
 0x11b   : > { %v311_v58 = vmul.f32 %v309_v15, %v305_v51  ;;  %v312_v59 = vmul.f32 %v309_v15, %v304_v50 }
 0x11d   : > { %v1344_v27 = vpop.permute.xlu1 %377  ;;  %v325_v28 = vpop.permute.xlu0 %324  ;;  %v316_v8 = vcombine.low %v311_v58, %v312_v59 }
 0x11e   : > { %v329_v60 = vsel %vm326_vm3, %v325_v28, %v321_v26 }
 0x11f   : > { %v336_v11 = vmul.f32 %v332_v17, %v329_v60 }
 0x121   : > { %v323_v29 = vpop.permute.xlu1 %322  ;;  %v344_v30 = vpop.permute.xlu0 %343  ;;  %v342_v24 = vadd.f32 %v336_v11, %v319_v18 }
 0x122   : > { %v327_v55 = vsel %vm326_vm3, %v323_v29, %v325_v28  ;;  %v328_v56 = vsel %vm326_vm3, %v321_v26, %v323_v29  ;;  %v318_v28 = vadd.f32 %v316_v8, %v295_v20 }
 0x123   : > { %v334_v5 = vmul.f32 %v332_v17, %v328_v56  ;;  %v335_v6 = vmul.f32 %v332_v17, %v327_v55 }
 0x125   : > { %v1346_v31 = vpop.permute.xlu1 %400  ;;  %v348_v32 = vpop.permute.xlu0 %347  ;;  %v339_v21 = vcombine.low %v334_v5, %v335_v6 }
 0x126   : > { %v352_v7 = vsel %vm349_vm4, %v348_v32, %v344_v30 }
 0x127   : > { %v359_v19 = vmul.f32 %v1342_v22, %v352_v7 }
 0x129   : > { %v346_v36 = vpop.permute.xlu1 %345  ;;  %v367_v37 = vpop.permute.xlu0 %366  ;;  %v365_v35 = vadd.f32 %v359_v19, %v342_v24 }
 0x12a   : > { %v350_v1 = vsel %vm349_vm4, %v346_v36, %v348_v32  ;;  %v351_v2 = vsel %vm349_vm4, %v344_v30, %v346_v36 }
 0x12b   : > { %v357_v12 = vmul.f32 %v1342_v22, %v351_v2  ;;  %v358_v13 = vmul.f32 %v1342_v22, %v350_v1  ;;  %v458_v1 = vld [vmem:[#allocation7] sm:$0xff] }
 0x12d   : > { %v1350_v41 = vpop.permute.xlu1 %423  ;;  %v371_v42 = vpop.permute.xlu0 %370  ;;  %v362_v29 = vcombine.low %v357_v12, %v358_v13 }
 0x12e   : > { %v375_v14 = vsel %vm372_vm5, %v371_v42, %v367_v37 }
 0x12f   : > { %v382_v25 = vmul.f32 %v1344_v27, %v375_v14 }
 0x131   : > { %v369_v46 = vpop.permute.xlu1 %368  ;;  %v390_v47 = vpop.permute.xlu0 %389 }
 0x132   : > { %v373_v3 = vsel %vm372_vm5, %v369_v46, %v371_v42  ;;  %v374_v17 = vsel %vm372_vm5, %v367_v37, %v369_v46  ;;  %v341_v37 = vadd.f32 %v339_v21, %v318_v28  ;;  %v388_v42 = vadd.f32 %v382_v25, %v365_v35 }
 0x133   : > { %v380_v30 = vmul.f32 %v1344_v27, %v374_v17  ;;  %v381_v32 = vmul.f32 %v1344_v27, %v373_v3 }
 0x134   : > { %v364_v44 = vadd.f32 %v362_v29, %v341_v37 }
 0x135   : > { %v1363_v61 = vpop.permute.xlu1 %446  ;;  %v394_v62 = vpop.permute.xlu0 %393  ;;  %v385_v45 = vcombine.low %v380_v30, %v381_v32 }
 0x136   : > { %v398_v23 = vsel %vm395_vm6, %v394_v62, %v390_v47 }
 0x137   : > { %v405_v36 = vmul.f32 %v1346_v31, %v398_v23  ;;  %v387_v54 = vadd.f32 %v385_v45, %v364_v44 }
 0x139   : > { %v392_v15 = vpop.permute.xlu1 %391  ;;  %v415_v16 = vpop.permute.xlu0 %414 }
 0x13a   : > { %v396_v26 = vsel %vm395_vm6, %v392_v15, %v394_v62  ;;  %v397_v22 = vsel %vm395_vm6, %v390_v47, %v392_v15  ;;  %v411_v47 = vadd.f32 %v405_v36, %v388_v42 }
 0x13b   : > { %v403_v38 = vmul.f32 %v1346_v31, %v397_v22  ;;  %v404_v39 = vmul.f32 %v1346_v31, %v396_v26 }
 0x13d   : > { %v413_v33 = vpop.permute.xlu1 %412  ;;  %v436_v34 = vpop.permute.xlu0 %435  ;;  %v408_v50 = vcombine.low %v403_v38, %v404_v39 }
 0x13e   : > { %v420_v43 = vsel %vm418_vm7, %v413_v33, %v415_v16 }
 0x13f   : > { %v426_v51 = vmul.f32 %v1350_v41, %v420_v43  ;;  %v410_v62 = vadd.f32 %v408_v50, %v387_v54 }
 0x141   : > { %v417_v46 = vpop.permute.xlu1 %416  ;;  %v440_v27 = vpop.permute.xlu0 %439 }
 0x142   : > { %v419_v48 = vsel %vm418_vm7, %v415_v16, %v417_v46  ;;  %v421_v49 = vsel %vm418_vm7, %v417_v46, %v413_v33  ;;  %v444_v31 = vsel %vm441_vm8, %v440_v27, %v436_v34 }
 0x143   : > { %v427_v52 = vmul.f32 %v1350_v41, %v419_v48  ;;  %v428_v53 = vmul.f32 %v1350_v41, %v421_v49  ;;  %v451_v57 = vmul.f32 %v1363_v61, %v444_v31 }
 0x145   : > { %v431_v55 = vcombine.low %v426_v51, %v427_v52  ;;  %v434_v56 = vadd.f32 %v428_v53, %v411_v47  ;;  %v438_v58 = vpop.permute.xlu1 %437 }
 0x146   : > { %v442_v59 = vsel %vm441_vm8, %v438_v58, %v440_v27  ;;  %v443_v60 = vsel %vm441_vm8, %v436_v34, %v438_v58 }
 0x147   : > { %v449_v63 = vmul.f32 %v1363_v61, %v443_v60  ;;  %v450_v41 = vmul.f32 %v1363_v61, %v442_v59  ;;  %v457_v0 = vadd.f32 %v451_v57, %v434_v56  ;;  %v433_v4 = vadd.f32 %v431_v55, %v410_v62 }
 0x149   : > { %v454_v2 = vcombine.low %v449_v63, %v450_v41  ;;  %759 = vmatpush3.msk.msra.mxu1 %vm472_vm9, %v457_v0  ;;  %v463_v40 = vpop.permute.xlu1 %462 }
 0x14a   : > { %761 = vmatmul.mubr.msk.f32.vlgmr.msra.gmra.mrb[0].mxu1 %vm468_vm10, %v458_v1 }
 0x14b   : > { %v456_v5 = vadd.f32 %v454_v2, %v433_v4 }
 0x14d   : > { %v467_v6 = vcombine.high %v456_v5, %v456_v5 }
 0x14f   : > { %748 = vmatprep.subr.msk.mxu0 %vm472_vm9, %v467_v6 }
 0x150   : > { %749 = vmatpush1.msk.msra.mxu0 %vm472_vm9, %v456_v5 }
 0x151   : > { %750 = vmatmul.mubr.msk.f32.vlgmr.msra.gmra.mrb[0].mxu0 %vm468_vm10, %v458_v1 }
 0x21d   : > { %v616_v7 = vpop.f32.mrb[0].mxu1 }
 0x21e   : > { %v617_v9 = vadd.f32 %v616_v7, %v463_v40  ;;  %v762_v10 = vpop.f32.mrb[1].mxu1 }
 0x220   : > { %622 = vst [vmem:[%s251_s9 + $0x10] sm:$0xff] %v617_v9 }
 0x224   : > { %v545_v61 = vpop.f32.mrb[0].mxu0 }
 0x225   : > { %v546_v11 = vadd.f32 %v545_v61, %v463_v40  ;;  %v547_v8 = vpop.f32.mrb[1].mxu0 }
 0x226   : > { %v548_v12 = vadd.f32 %v547_v8, %v463_v40 }
 0x227   : > { %620 = vst [vmem:[%s251_s9] sm:$0xff] %v546_v11 }
 0x228   : > { %621 = vst [vmem:[%s251_s9 + $0x8] sm:$0xff] %v548_v12 }
 0x229   : > { %1004 = shalt.err (!%p1001_p13)
}
 0x22a   : > { %s1005_s24 = scalar_lea.hbm %s1420_s5, 384  ;;  %s1009_s29 = scalar_lea.hbm %s1468_s4, 768 }
 0x22b   : > { %p1006_p5 = scmp.ne.s32.totalorder %s1420_s5, %s1005_s24  ;;  %p1010_p11 = scmp.lt.u32.totalorder %s1420_s5, %s1468_s4 }
 0x22c   : > { %p1011_p12 = scmp.lt.u32.totalorder %s1009_s29, %s1005_s24  ;;  %p1013_p1 = scmp.lt.u32.totalorder %s1005_s24, %s1420_s5 }
 0x22d   : > { %p1007_p0 = pnand %p1006_p5, %p1259_p6 }
 0x22e   : > { %p1012_p2 = por %p1011_p12, %p1010_p11 }
 0x22f   : > { %p1008_p9 = pneg %p1007_p0 }
 0x230   : > { %p1014_p4 = por %p1013_p1, %p1012_p2 }
 0x232   : > { %p1015_p8 = pnand %p1014_p4, %p1008_p9 }
 0x234   : > { %1018 = shalt.err (!%p1015_p8)
}
 0x235   : > { %782 = dma.vmem_to_hbm [thread:$0]  (%p1259_p6), %s1422_s13, 384, %s1420_s5, %s624_s6  }
 0x236 PF: > { %s650_s11 = sand.u32 1, %s1053_s15   ;;  %p1486_p3 = scmp.ne.s32.totalorder %s1473_s22, 0 }
 0x237   : > { %p1487_p7 = scmp.ge.s32.totalorder %s1065_s18, 2  ;;  %s651_s9 = scalar_lea.sflag [#allocation4], %s650_s11 }
 0x239   : > { %p799_p10 = pnand %p1487_p7, %p1486_p3 }
 0x23b   : > { %1048 = dma.done.wait (!%p799_p10), %s651_s9, 384  }
 0x23c   : > { %1050 = vsyncadd (!%p799_p10), %s651_s9, 4294966912  ;;  %p19_p13 = scmp.ge.s32.totalorder %s1245_s10, 4   ;;  %s1488_s15 = smov %s1057_s16 }
 0x23d   : > { %s1489_s16 = smov %s1061_s17  ;;  %s1490_s17 = smov %s1255_s8 }
 0x23e   : > { %s1491_s18 = smov %s1245_s10  ;;  %21 = sbr.rel (!%p19_p13) target bundleno = 7 (0x7), region = 93 }
 0x245   :  { %656 = vsyncpa [#allocation3], 1 }
 0x246   :  { %658 = vsyncpa [#allocation3 + $0x1], 1 }
 0x247   :  { %659 = vsyncpa [#allocation6], 1 }
 0x248   :  { %660 = vsyncpa [#allocation9], 1 }
 0x249   :  { %661 = vsyncpa [#allocation4], 1 }
 0x24a   :  { %663 = vsyncpa [#allocation4 + $0x1], 1 }

</bundles_post_ra>
